<compile_context>
chip_gen: v6e
topology: v6e:2x2x1
jax: 0.10.0
libtpu: 0.0.40
codegen_flags: <defaults>
</compile_context>

<pallas_src>
import functools
import math

import jax
import jax.numpy as jnp
from jax import lax
from jax.experimental import pallas as pl
from jax.experimental.pallas import tpu as pltpu


HIDDEN = 128                  # per-head hidden width (PyTorch PolicyNet)
PACKED_HIDDEN = 2 * HIDDEN    # actor + critic hidden packed side-by-side
ROW_ALIGN = 16                # bf16 sublane packing -> 16-row-aligned batch tiles
MAX_TILE_B = 4096             # review: 512 is step-overhead bound; 2048-4096 target


def _round_up(x, m):
    return ((x + m - 1) // m) * m


def _cdiv(a, b):
    return -(-a // b)


def _is_v5e():
    """Static (host-side) chip check used to gate the w2-split path."""
    try:
        dk = jax.devices()[0].device_kind.lower()
    except Exception:
        return False
    return ("v5 lite" in dk) or ("v5e" in dk) or ("v5litepod" in dk)


# ----------------------------------------------------------------------------
# Kernel
# ----------------------------------------------------------------------------
def _fused_actor_critic_kernel(x_ref, w1_ref, b1_ref, w2_ref, b2_ref,
                               w3_ref, b3_ref, out_ref, *, action_size,
                               split_w2):
    """Fused Actor+Critic MLP on one batch tile.

    x:   (TB, S) bf16       w1: (S, 256) bf16       b1: (1, 256) f32
                            w2: (256, 256) bf16     b2: (1, 256) f32
                            w3: (256, OUT_PAD) bf16 b3: (1, OUT_PAD) f32
    out: (TB, OUT_PAD) f32  — lanes [0,A): softmax(actor logits),
                              lane A: raw critic value, rest: zero padding.
    """
    x = x_ref[...]    # already bf16 (cast in wrapper -> half the input DMA)

    h1 = jnp.dot(x, w1_ref[...], preferred_element_type=jnp.float32) + b1_ref[...]
    h1 = jnp.maximum(h1, 0.0).astype(jnp.bfloat16)

    if split_w2:
        # v5e (4x 128x128 MXU): the block-diagonal 256-wide matmul is 50% zeros
        # -> run the actor / critic halves as independent 128-wide matmuls and
        #    feed the third layer as two 128-deep partial matmuls (no concat).
        h2a = jnp.dot(h1[:, :HIDDEN], w2_ref[:HIDDEN, :HIDDEN],
                      preferred_element_type=jnp.float32) + b2_ref[:, :HIDDEN]
        h2c = jnp.dot(h1[:, HIDDEN:], w2_ref[HIDDEN:, HIDDEN:],
                      preferred_element_type=jnp.float32) + b2_ref[:, HIDDEN:]
        h2a = jnp.maximum(h2a, 0.0).astype(jnp.bfloat16)
        h2c = jnp.maximum(h2c, 0.0).astype(jnp.bfloat16)
        logits = (jnp.dot(h2a, w3_ref[:HIDDEN, :],
                          preferred_element_type=jnp.float32)
                  + jnp.dot(h2c, w3_ref[HIDDEN:, :],
                            preferred_element_type=jnp.float32)
                  + b3_ref[...])
    else:
        # v6e / v7x (256x256 MXU): packed 256-wide path fills the MXU.
        h2 = jnp.dot(h1, w2_ref[...],
                     preferred_element_type=jnp.float32) + b2_ref[...]
        h2 = jnp.maximum(h2, 0.0).astype(jnp.bfloat16)
        logits = jnp.dot(h2, w3_ref[...],
                         preferred_element_type=jnp.float32) + b3_ref[...]

    # Masked softmax over the actor lanes only; critic/pad lanes pass through.
    col = lax.broadcasted_iota(jnp.int32, logits.shape, 1)
    actor_mask = col < action_size
    masked = jnp.where(actor_mask, logits, -1e30)     # mask BEFORE exp (safe)
    m = jnp.max(masked, axis=-1, keepdims=True)
    e = jnp.where(actor_mask, jnp.exp(masked - m), 0.0)
    denom = jnp.sum(e, axis=-1, keepdims=True)
    pi = e / denom                                    # exact divide (log-prob safe)

    out_ref[...] = jnp.where(actor_mask, pi, logits)


# ----------------------------------------------------------------------------
# pallas_call wrapper
# ----------------------------------------------------------------------------
def actor_critic_forward(x, packed, *, action_size, tile_b, split_w2):
    """x: (B_pad, S) bf16 with B_pad a multiple of tile_b. Returns (B_pad, OUT_PAD) f32."""
    b_pad, s = x.shape
    out_pad = packed["w3"].shape[1]
    nb = b_pad // tile_b

    flops = 2 * b_pad * (s * PACKED_HIDDEN
                         + PACKED_HIDDEN * PACKED_HIDDEN
                         + PACKED_HIDDEN * out_pad)
    bytes_accessed = int(x.size * x.dtype.itemsize + b_pad * out_pad * 4
                         + sum(int(v.size) * v.dtype.itemsize
                               for v in packed.values()))
    cost = pl.CostEstimate(flops=int(flops),
                           transcendentals=int(b_pad * action_size),
                           bytes_accessed=bytes_accessed)

    kernel = functools.partial(_fused_actor_critic_kernel,
                               action_size=action_size, split_w2=split_w2)

    grid_spec = pltpu.PrefetchScalarGridSpec(
        num_scalar_prefetch=0,
        grid=(nb,),
        in_specs=[
            pl.BlockSpec((tile_b, s), lambda i: (i, 0)),                       # x tile
            pl.BlockSpec((s, PACKED_HIDDEN), lambda i: (0, 0)),                # w1 resident
            pl.BlockSpec((1, PACKED_HIDDEN), lambda i: (0, 0)),                # b1
            pl.BlockSpec((PACKED_HIDDEN, PACKED_HIDDEN), lambda i: (0, 0)),    # w2
            pl.BlockSpec((1, PACKED_HIDDEN), lambda i: (0, 0)),                # b2
            pl.BlockSpec((PACKED_HIDDEN, out_pad), lambda i: (0, 0)),          # w3
            pl.BlockSpec((1, out_pad), lambda i: (0, 0)),                      # b3
        ],
        out_specs=pl.BlockSpec((tile_b, out_pad), lambda i: (i, 0)),
    )

    return pl.pallas_call(
        kernel,
        out_shape=jax.ShapeDtypeStruct((b_pad, out_pad), jnp.float32),
        grid_spec=grid_spec,
        compiler_params=pltpu.CompilerParams(
            dimension_semantics=("parallel",),        # megacore sharding on v7x
            vmem_limit_bytes=32 * 1024 * 1024),       # v5e scoped default is 16 MiB
        cost_estimate=cost,
    )(x, packed["w1"], packed["b1"], packed["w2"], packed["b2"],
      packed["w3"], packed["b3"])


# ----------------------------------------------------------------------------
# Tiling choice (review items 1, 2, 6)
# ----------------------------------------------------------------------------
def _choose_tiling(b, s, out_pad):
    """Pick (tile_b, b_pad): 16-row aligned, VMEM-budgeted, >=2 tiles when possible."""
    # Double-buffered activation bytes per row (x bf16 in + out f32 back).
    per_row = 2 * (s * 2 + out_pad * 4)
    budget_rows = max(ROW_ALIGN, (8 * 1024 * 1024) // max(per_row, 1))
    max_tile = max(ROW_ALIGN,
                   min(MAX_TILE_B, (budget_rows // ROW_ALIGN) * ROW_ALIGN))

    b_al = _round_up(max(b, 1), ROW_ALIGN)
    n_tiles = _cdiv(b_al, max_tile)
    if b_al >= 2 * ROW_ALIGN:
        n_tiles = max(n_tiles, 2)        # keep both v7x TensorCores busy
    tile_b = _round_up(_cdiv(b_al, n_tiles), ROW_ALIGN)
    b_pad = _round_up(b_al, tile_b)
    return tile_b, b_pad


# ----------------------------------------------------------------------------
# Parameter init (matches nn.Linear U(-1/sqrt(fan_in), 1/sqrt(fan_in))) + packing
# ----------------------------------------------------------------------------
def init_policy_net_params(key, state_size, out_size):
    keys = jax.random.split(key, 6)

    def linear(kw, kb, fan_in, fan_out):
        bound = 1.0 / math.sqrt(fan_in)
        w = jax.random.uniform(kw, (fan_in, fan_out), jnp.float32, -bound, bound)
        b = jax.random.uniform(kb, (1, fan_out), jnp.float32, -bound, bound)
        return w, b

    w1, b1 = linear(keys[0], keys[1], state_size, HIDDEN)
    w2, b2 = linear(keys[2], keys[3], HIDDEN, HIDDEN)
    w3, b3 = linear(keys[4], keys[5], HIDDEN, out_size)
    return {"w1": w1, "b1": b1, "w2": w2, "b2": b2, "w3": w3, "b3": b3}


def pack_actor_critic_params(pi_p, v_p, action_size, out_pad):
    """Pack actor (128-wide) + critic (128-wide) heads into one 256-wide stack."""
    a = action_size
    w1 = jnp.concatenate([pi_p["w1"], v_p["w1"]], axis=1).astype(jnp.bfloat16)
    b1 = jnp.concatenate([pi_p["b1"], v_p["b1"]], axis=1).astype(jnp.float32)

    z = jnp.zeros((HIDDEN, HIDDEN), jnp.float32)
    w2 = jnp.concatenate(
        [jnp.concatenate([pi_p["w2"], z], axis=1),
         jnp.concatenate([z, v_p["w2"]], axis=1)], axis=0).astype(jnp.bfloat16)
    b2 = jnp.concatenate([pi_p["b2"], v_p["b2"]], axis=1).astype(jnp.float32)

    w3 = jnp.zeros((PACKED_HIDDEN, out_pad), jnp.float32)
    w3 = w3.at[:HIDDEN, :a].set(pi_p["w3"])
    w3 = w3.at[HIDDEN:, a:a + 1].set(v_p["w3"])
    w3 = w3.astype(jnp.bfloat16)

    b3 = jnp.zeros((1, out_pad), jnp.float32)
    b3 = b3.at[:, :a].set(pi_p["b3"])
    b3 = b3.at[:, a:a + 1].set(v_p["b3"])

    return {"w1": w1, "b1": b1, "w2": w2, "b2": b2, "w3": w3, "b3": b3}


# ----------------------------------------------------------------------------
# Module wrapper
# ----------------------------------------------------------------------------
class ActorCriticNetPallas:
    """JAX/Pallas port of ActorCriticNet (Actor PI + Critic V, fused kernel)."""

    def __init__(self, state_size, action_size, key):
        k_pi, k_v = jax.random.split(key)
        self.state_size = state_size
        self.action_size = action_size
        self.out_pad = _round_up(action_size + 1, 128)   # lane-dense output slab
        self.pi_params = init_policy_net_params(k_pi, state_size, action_size)
        self.v_params = init_policy_net_params(k_v, state_size, 1)
        self.packed = pack_actor_critic_params(self.pi_params, self.v_params,
                                               action_size, self.out_pad)
        self.split_w2 = _is_v5e()        # packed 256-wide w2 kept on v6e/v7x

    def __call__(self, state, batch_mode=False):
        state = jnp.asarray(state, jnp.float32)
        if not batch_mode:
            state = state[None, ...]                     # unsqueeze(0)
        state = state.reshape(state.shape[0], -1)        # view(B, -1)
        state = state.astype(jnp.bfloat16)               # halve the x DMA
        b = state.shape[0]

        tile_b, b_pad = _choose_tiling(b, self.state_size, self.out_pad)
        if b_pad != b:
            state = jnp.pad(state, ((0, b_pad - b), (0, 0)))

        out = actor_critic_forward(state, self.packed,
                                   action_size=self.action_size,
                                   tile_b=tile_b,
                                   split_w2=self.split_w2)
        pi = out[:b, :self.action_size]                  # softmax probs (B, A)
        v = out[:b, self.action_size]                    # squeezed value  (B,)
        return pi, v


# ----------------------------------------------------------------------------
# Pure-JAX f32 reference (for correctness check)
# ----------------------------------------------------------------------------
def _reference_forward(state2d, pi_p, v_p):
    def mlp(p, x):
        h = jnp.maximum(x @ p["w1"] + p["b1"], 0.0)
        h = jnp.maximum(h @ p["w2"] + p["b2"], 0.0)
        return h @ p["w3"] + p["b3"]
    pi = jax.nn.softmax(mlp(pi_p, state2d), axis=-1)
    v = mlp(v_p, state2d)[:, 0]
    return pi, v


if __name__ == "__main__":
    key = jax.random.PRNGKey(0)
    k_param, k_state = jax.random.split(key)

    batch = 2
    state_size = 16
    action_size = 8

    net = ActorCriticNetPallas(state_size, action_size, k_param)

    # state arrives as an array (torch code wraps np.array(state)); flattened in wrapper
    state = jax.random.normal(k_state, (batch, 4, 4), jnp.float32)  # 4*4 == state_size

    pi, v = net(state, batch_mode=True)
    jax.block_until_ready(pi)
    jax.block_until_ready(v)

    assert pi.shape == (batch, action_size)
    assert v.shape == (batch,)
    assert bool(jnp.all(jnp.isfinite(pi))) and bool(jnp.all(jnp.isfinite(v)))
    # exact divide -> softmax rows sum to 1 tightly
    assert bool(jnp.all(jnp.abs(jnp.sum(pi, axis=-1) - 1.0) < 1e-4))

    # compare against a pure-JAX f32 reference (kernel uses bf16 weights/inputs)
    pi_ref, v_ref = _reference_forward(state.reshape(batch, -1),
                                       net.pi_params, net.v_params)
    assert bool(jnp.all(jnp.abs(pi - pi_ref) < 5e-2))
    assert bool(jnp.all(jnp.abs(v - v_ref) < 5e-2))

    # non-batched path (unsqueeze(0) semantics)
    pi1, v1 = net(state[0], batch_mode=False)
    jax.block_until_ready(pi1)
    assert pi1.shape == (1, action_size) and v1.shape == (1,)

    print("KERNEL_OK")
</pallas_src>

<mosaic_0001>
module attributes {stable_mosaic.version = 11 : i64} {
  func.func @_fused_actor_critic_kernel(%arg0: i32, %arg1: memref<16x16xbf16, #tpu.memory_space<vmem>>, %arg2: memref<16x256xbf16, #tpu.memory_space<vmem>>, %arg3: memref<1x256xf32, #tpu.memory_space<vmem>>, %arg4: memref<256x256xbf16, #tpu.memory_space<vmem>>, %arg5: memref<1x256xf32, #tpu.memory_space<vmem>>, %arg6: memref<256x128xbf16, #tpu.memory_space<vmem>>, %arg7: memref<1x128xf32, #tpu.memory_space<vmem>>, %arg8: memref<16x128xf32, #tpu.memory_space<vmem>>) attributes {dimension_semantics = [#tpu.dimension_semantics<parallel>], iteration_bounds = array<i64: 1>, scalar_prefetch = 0 : i64, scratch_operands = 0 : i64, tpu.core_type = #tpu.core_type<tc>, window_params = [{transform_indices = @transform_0, window_bounds = array<i64: 16, 16>}, {pipeline_mode = #tpu.pipeline_mode<synchronous>, transform_indices = @transform_1, window_bounds = array<i64: 16, 256>}, {pipeline_mode = #tpu.pipeline_mode<synchronous>, transform_indices = @transform_2, window_bounds = array<i64: 1, 256>}, {pipeline_mode = #tpu.pipeline_mode<synchronous>, transform_indices = @transform_3, window_bounds = array<i64: 256, 256>}, {pipeline_mode = #tpu.pipeline_mode<synchronous>, transform_indices = @transform_4, window_bounds = array<i64: 1, 256>}, {pipeline_mode = #tpu.pipeline_mode<synchronous>, transform_indices = @transform_5, window_bounds = array<i64: 256, 128>}, {pipeline_mode = #tpu.pipeline_mode<synchronous>, transform_indices = @transform_6, window_bounds = array<i64: 1, 128>}, {transform_indices = @transform_7, window_bounds = array<i64: 16, 128>}]} {
    %c0 = arith.constant 0 : index
    %c0_0 = arith.constant 0 : index
    %0 = vector.load %arg1[%c0, %c0_0] : memref<16x16xbf16, #tpu.memory_space<vmem>>, vector<16x16xbf16>
    %c0_1 = arith.constant 0 : index
    %c0_2 = arith.constant 0 : index
    %1 = vector.load %arg2[%c0_1, %c0_2] : memref<16x256xbf16, #tpu.memory_space<vmem>>, vector<16x256xbf16>
    %cst = arith.constant dense<0.000000e+00> : vector<16x256xf32>
    %2 = tpu.matmul %0, %1, %cst {dimension_numbers = #tpu.dot_dimension_numbers<[1], [0], [0], [1], [0, 0, 1, 1], [], []>} : vector<16x16xbf16>, vector<16x256xbf16>, vector<16x256xf32> -> vector<16x256xf32>
    %c0_3 = arith.constant 0 : index
    %c0_4 = arith.constant 0 : index
    %3 = vector.load %arg3[%c0_3, %c0_4] : memref<1x256xf32, #tpu.memory_space<vmem>>, vector<1x256xf32>
    %4 = vector.broadcast %3 : vector<1x256xf32> to vector<16x256xf32>
    %5 = arith.addf %2, %4 : vector<16x256xf32>
    %cst_5 = arith.constant 0.000000e+00 : f32
    %6 = vector.broadcast %cst_5 : f32 to vector<16x256xf32>
    %7 = arith.maximumf %5, %6 : vector<16x256xf32>
    %8 = arith.truncf %7 : vector<16x256xf32> to vector<16x256xbf16>
    %c0_6 = arith.constant 0 : index
    %c0_7 = arith.constant 0 : index
    %9 = vector.load %arg4[%c0_6, %c0_7] : memref<256x256xbf16, #tpu.memory_space<vmem>>, vector<256x256xbf16>
    %cst_8 = arith.constant dense<0.000000e+00> : vector<16x256xf32>
    %10 = tpu.matmul %8, %9, %cst_8 {dimension_numbers = #tpu.dot_dimension_numbers<[1], [0], [0], [1], [0, 0, 1, 1], [], []>} : vector<16x256xbf16>, vector<256x256xbf16>, vector<16x256xf32> -> vector<16x256xf32>
    %c0_9 = arith.constant 0 : index
    %c0_10 = arith.constant 0 : index
    %11 = vector.load %arg5[%c0_9, %c0_10] : memref<1x256xf32, #tpu.memory_space<vmem>>, vector<1x256xf32>
    %12 = vector.broadcast %11 : vector<1x256xf32> to vector<16x256xf32>
    %13 = arith.addf %10, %12 : vector<16x256xf32>
    %cst_11 = arith.constant 0.000000e+00 : f32
    %14 = vector.broadcast %cst_11 : f32 to vector<16x256xf32>
    %15 = arith.maximumf %13, %14 : vector<16x256xf32>
    %16 = arith.truncf %15 : vector<16x256xf32> to vector<16x256xbf16>
    %c0_12 = arith.constant 0 : index
    %c0_13 = arith.constant 0 : index
    %17 = vector.load %arg6[%c0_12, %c0_13] : memref<256x128xbf16, #tpu.memory_space<vmem>>, vector<256x128xbf16>
    %cst_14 = arith.constant dense<0.000000e+00> : vector<16x128xf32>
    %18 = tpu.matmul %16, %17, %cst_14 {dimension_numbers = #tpu.dot_dimension_numbers<[1], [0], [0], [1], [0, 0, 1, 1], [], []>} : vector<16x256xbf16>, vector<256x128xbf16>, vector<16x128xf32> -> vector<16x128xf32>
    %c0_15 = arith.constant 0 : index
    %c0_16 = arith.constant 0 : index
    %19 = vector.load %arg7[%c0_15, %c0_16] : memref<1x128xf32, #tpu.memory_space<vmem>>, vector<1x128xf32>
    %20 = vector.broadcast %19 : vector<1x128xf32> to vector<16x128xf32>
    %21 = arith.addf %18, %20 : vector<16x128xf32>
    %22 = tpu.iota {dimensions = array<i32: 1>} : vector<16x128xi32>
    %c8_i32 = arith.constant 8 : i32
    %23 = vector.broadcast %c8_i32 : i32 to vector<16x128xi32>
    %24 = arith.cmpi slt, %22, %23 : vector<16x128xi32>
    %cst_17 = arith.constant -1.000000e+30 : f32
    %25 = vector.broadcast %cst_17 : f32 to vector<16x128xf32>
    %26 = arith.select %24, %21, %25 : vector<16x128xi1>, vector<16x128xf32>
    %cst_18 = arith.constant dense<0xFF800000> : vector<16xf32>
    %27 = vector.multi_reduction <maximumf>, %26, %cst_18 [1] : vector<16x128xf32> to vector<16xf32>
    %28 = vector.shape_cast %27 : vector<16xf32> to vector<16x1xf32>
    %29 = vector.broadcast %28 : vector<16x1xf32> to vector<16x128xf32>
    %30 = arith.subf %26, %29 : vector<16x128xf32>
    %31 = math.exp %30 : vector<16x128xf32>
    %cst_19 = arith.constant 0.000000e+00 : f32
    %32 = vector.broadcast %cst_19 : f32 to vector<16x128xf32>
    %33 = arith.select %24, %31, %32 : vector<16x128xi1>, vector<16x128xf32>
    %cst_20 = arith.constant dense<0.000000e+00> : vector<16xf32>
    %34 = vector.multi_reduction <add>, %33, %cst_20 [1] : vector<16x128xf32> to vector<16xf32>
    %35 = vector.shape_cast %34 : vector<16xf32> to vector<16x1xf32>
    %36 = vector.broadcast %35 : vector<16x1xf32> to vector<16x128xf32>
    %37 = arith.divf %33, %36 : vector<16x128xf32>
    %38 = arith.select %24, %37, %21 : vector<16x128xi1>, vector<16x128xf32>
    %c0_21 = arith.constant 0 : index
    %c0_22 = arith.constant 0 : index
    %39 = vector.load %arg8[%c0_21, %c0_22] : memref<16x128xf32, #tpu.memory_space<vmem>>, vector<16x128xf32>
    tpu.vector_store %arg8[%c0_21, %c0_22], %38 {strides = array<i32>} : memref<16x128xf32, #tpu.memory_space<vmem>>, vector<16x128xf32>,
    return
  }
  func.func @transform_0(%arg0: i32) -> (i32, i32) {
    %c0_i32 = arith.constant 0 : i32
    %c0_i32_0 = arith.constant 0 : i32
    return %arg0, %c0_i32 : i32, i32
  }
  func.func @transform_1(%arg0: i32) -> (i32, i32) {
    %c0_i32 = arith.constant 0 : i32
    %c0_i32_0 = arith.constant 0 : i32
    %c0_i32_1 = arith.constant 0 : i32
    return %c0_i32, %c0_i32_0 : i32, i32
  }
  func.func @transform_2(%arg0: i32) -> (i32, i32) {
    %c0_i32 = arith.constant 0 : i32
    %c0_i32_0 = arith.constant 0 : i32
    %c0_i32_1 = arith.constant 0 : i32
    return %c0_i32, %c0_i32_0 : i32, i32
  }
  func.func @transform_3(%arg0: i32) -> (i32, i32) {
    %c0_i32 = arith.constant 0 : i32
    %c0_i32_0 = arith.constant 0 : i32
    %c0_i32_1 = arith.constant 0 : i32
    return %c0_i32, %c0_i32_0 : i32, i32
  }
  func.func @transform_4(%arg0: i32) -> (i32, i32) {
    %c0_i32 = arith.constant 0 : i32
    %c0_i32_0 = arith.constant 0 : i32
    %c0_i32_1 = arith.constant 0 : i32
    return %c0_i32, %c0_i32_0 : i32, i32
  }
  func.func @transform_5(%arg0: i32) -> (i32, i32) {
    %c0_i32 = arith.constant 0 : i32
    %c0_i32_0 = arith.constant 0 : i32
    %c0_i32_1 = arith.constant 0 : i32
    return %c0_i32, %c0_i32_0 : i32, i32
  }
  func.func @transform_6(%arg0: i32) -> (i32, i32) {
    %c0_i32 = arith.constant 0 : i32
    %c0_i32_0 = arith.constant 0 : i32
    %c0_i32_1 = arith.constant 0 : i32
    return %c0_i32, %c0_i32_0 : i32, i32
  }
  func.func @transform_7(%arg0: i32) -> (i32, i32) {
    %c0_i32 = arith.constant 0 : i32
    %c0_i32_0 = arith.constant 0 : i32
    return %arg0, %c0_i32 : i32, i32
  }
}

</mosaic_0001>

<bundles_post_ra>
// kernel: tpu_custom_call.1
= control target key start
LH: loop header
LB: loop body
LE: loop exit
PB: predicated region body
PF: predicated region fallthrough
CT: control target
= control target key end

     0   :  { %12 = vsyncpa [#allocation3], 0  ;;  %s1002_s0 = inlined_call_operand.hbm [shape: bf16[16,16], index: 0, kind: input, shape index: {}]   ;;  %s1003_s1 = inlined_call_operand.hbm [shape: bf16[16,256], index: 1, kind: input, shape index: {}]   ;;  %s1004_s2 = inlined_call_operand.vmem [shape: f32[1,256], index: 2, kind: input, shape index: {}]   ;;  %s1005_s3 = inlined_call_operand.hbm [shape: bf16[256,256], index: 3, kind: input, shape index: {}]   ;;  %s1006_s4 = inlined_call_operand.vmem [shape: f32[1,256], index: 4, kind: input, shape index: {}]   ;;  %s1007_s5 = inlined_call_operand.hbm [shape: bf16[256,128], index: 5, kind: input, shape index: {}]   ;;  %s1008_s6 = inlined_call_operand.vmem [shape: f32[1,128], index: 6, kind: input, shape index: {}]   ;;  %s1009_s7 = inlined_call_operand.hbm [shape: f32[16,128], index: 7, kind: output, shape index: {}]  }
   0x1   :  { %13 = vsyncpa [#allocation6], 0 }
   0x2   :  { %14 = vsyncpa [#allocation9], 0 }
   0x3   :  { %15 = vsyncpa [#allocation4], 0  ;;  %s913_s24 = smov [#allocation5]  }
   0x4   :  { %s33_s25 = sshll.u32 %s913_s24, 4  ;;  %s34_s25 = int_to_ptr.vmem [resolvable:$true] %s33_s25 }
   0x5   :  { %s813_s26 = scalar_lea.vmem %s34_s25, 256  ;;  %p818_p1 = scmp.lt.s32.totalorder %s34_s25, %s34_s25 }
   0x6   :  { %p814_p0 = scmp.ne.s32.totalorder %s34_s25, %s813_s26  ;;  %p819_p2 = scmp.lt.s32.totalorder %s813_s26, %s813_s26 }
   0x8   :  { %p820_p3 = por %p819_p2, %p818_p1 }
   0xa   :  { %p821_p4 = pnand %p820_p3, %p814_p0 }
   0xc   :  { %824 = shalt.err (!%p821_p4)
}
   0xd   :  { %s914_s27 = smov 128   ;;  %s915_s28 = smov 8  }
   0xe   :  { %39 = dma.hbm_to_vmem [thread:$0]  %s1003_s1, 256, %s34_s25, [#allocation6], %s914_s27, %s914_s27, %s915_s28  }
   0xf   :  { %s916_s8 = smov [#allocation2]  }
  0x10   :  { %s21_s9 = sshll.u32 %s916_s8, 4  ;;  %s22_s9 = int_to_ptr.vmem [resolvable:$true] %s21_s9 }
  0x11   :  { %s833_s10 = scalar_lea.vmem %s22_s9, 128  ;;  %p838_p6 = scmp.lt.s32.totalorder %s22_s9, %s22_s9 }
  0x12   :  { %p834_p5 = scmp.ne.s32.totalorder %s22_s9, %s833_s10  ;;  %p839_p7 = scmp.lt.s32.totalorder %s833_s10, %s833_s10 }
  0x14   :  { %p840_p8 = por %p839_p7, %p838_p6 }
  0x16   :  { %p841_p9 = pnand %p840_p8, %p834_p5 }
  0x18   :  { %844 = shalt.err (!%p841_p9)
}
  0x19   :  { %s917_s11 = smov 64   ;;  %s918_s12 = smov 4  }
  0x1a   :  { %27 = dma.hbm_to_vmem [thread:$0]  %s1002_s0, 128, %s22_s9, [#allocation3], %s917_s11, %s917_s11, %s918_s12  }
  0x1b   :  { %s919_s15 = smov [#allocation7]   ;;  %s920_s17 = smov [#allocation8]  }
  0x1c   :  { %s47_s16 = sshll.u32 %s919_s15, 4  ;;  %s61_s1 = sshll.u32 %s920_s17, 4  ;;  %s48_s16 = int_to_ptr.vmem [resolvable:$true] %s47_s16  ;;  %s62_s1 = int_to_ptr.vmem [resolvable:$true] %s61_s1 }
  0x1d   :  { %s853_s18 = scalar_lea.vmem %s48_s16, 4096  ;;  %p858_p11 = scmp.lt.s32.totalorder %s48_s16, %s48_s16 }
  0x1e   :  { %p854_p10 = scmp.ne.s32.totalorder %s48_s16, %s853_s18  ;;  %p859_p12 = scmp.lt.s32.totalorder %s853_s18, %s853_s18 }
  0x20   :  { %p860_p13 = por %p859_p12, %p858_p11 }
  0x22   :  { %p861_p0 = pnand %p860_p13, %p854_p10 }
  0x24   :  { %864 = shalt.err (!%p861_p0)
}
  0x25   :  { %53 = dma.hbm_to_vmem [thread:$0]  %s1005_s3, 4096, %s48_s16, [#allocation6], %s914_s27, %s914_s27, %s915_s28  }
  0x26   :  { %s873_s0 = scalar_lea.vmem %s62_s1, 2048  ;;  %p878_p2 = scmp.lt.s32.totalorder %s62_s1, %s62_s1 }
  0x27   :  { %p874_p1 = scmp.ne.s32.totalorder %s62_s1, %s873_s0  ;;  %p879_p3 = scmp.lt.s32.totalorder %s873_s0, %s873_s0 }
  0x29   :  { %p880_p4 = por %p879_p3, %p878_p2 }
  0x2b   :  { %p881_p5 = pnand %p880_p4, %p874_p1 }
  0x2d   :  { %884 = shalt.err (!%p881_p5)
}
  0x2e   :  { %67 = dma.hbm_to_vmem [thread:$0]  %s1007_s5, 2048, %s62_s1, [#allocation9], %s917_s11, %s917_s11, %s918_s12  }
  0x2f   :  { %905 = dma.done.wait [#allocation3], 128  }
  0x30   :  { %906 = vsyncadd [#allocation3], 4294967168 }
  0x31   :  { %907 = dma.done.wait [#allocation6], 4352  }
  0x32   :  { %908 = vsyncadd [#allocation6], 4294962944 }
  0x33   :  { %909 = dma.done.wait [#allocation9], 2048  }
  0x34   :  { %910 = vsyncadd [#allocation9], 4294965248  ;;  %v921_v0 = vmov 0   ;;  %v729_v1 = vld [vmem:[#allocation5 + $0x4] ss:$8 sps:$4 sm:$0xff]   ;;  %v732_v3 = vld [vmem:[#allocation2] sm:$0xff]   ;;  %v89_v46 = vlaneseq }
  0x35   :  { %150 = vmatprep.mubr.bf16.mxu0 %v921_v0  ;;  %v731_v2 = vld [vmem:[#allocation5] ss:$8 sps:$4 sm:$0xff]   ;;  %132 = vmatprep.subr.bf16.mxu0 %v729_v1  ;;  %vm114_vm0 = vcmask 130048   ;;  %v733_v4 = vld [vmem:[#allocation7 + $0x74] ss:$8 sps:$4 sm:$0xff]   ;;  %v785_v40 = vld [vmem:[#allocation8 + $0x68] sm:$0xff]  }
  0x36   :  { %133 = vmatpush1.bf16.msra.mxu0 %v731_v2  ;;  %v735_v5 = vld [vmem:[#allocation7 + $0x70] ss:$8 sps:$4 sm:$0xff]   ;;  %v736_v6 = vld [vmem:[#allocation7 + $0x64] ss:$8 sps:$4 sm:$0xff]   ;;  %371 = vmatprep.subr.bf16.mxu1 %v733_v4  ;;  %v738_v7 = vld [vmem:[#allocation7 + $0x60] ss:$8 sps:$4 sm:$0xff]  }
  0x37   :  { %372 = vmatpush1.bf16.msra.mxu1 %v735_v5  ;;  %v739_v8 = vld [vmem:[#allocation7 + $0x54] ss:$8 sps:$4 sm:$0xff]   ;;  %v741_v9 = vld [vmem:[#allocation7 + $0x50] ss:$8 sps:$4 sm:$0xff]   ;;  %v742_v10 = vld [vmem:[#allocation7 + $0x44] ss:$8 sps:$4 sm:$0xff]  }
  0x38   :  { %373 = vmatprep.subr.bf16.mxu1 %v736_v6  ;;  %v744_v11 = vld [vmem:[#allocation7 + $0x40] ss:$8 sps:$4 sm:$0xff]   ;;  %v745_v12 = vld [vmem:[#allocation7 + $0x34] ss:$8 sps:$4 sm:$0xff]   ;;  %v747_v13 = vld [vmem:[#allocation7 + $0x30] ss:$8 sps:$4 sm:$0xff]  }
  0x39   :  { %647 = vmatmul.mubr.msk.bf16.vlgmr.msra.gmra.mxu0 %vm114_vm0, %v732_v3  ;;  %v748_v14 = vld [vmem:[#allocation7 + $0x24] ss:$8 sps:$4 sm:$0xff]   ;;  %v750_v15 = vld [vmem:[#allocation7 + $0x20] ss:$8 sps:$4 sm:$0xff]   ;;  %v751_v16 = vld [vmem:[#allocation7 + $0x14] ss:$8 sps:$4 sm:$0xff]  }
  0x3a   :  { %v753_v17 = vld [vmem:[#allocation7 + $0x10] ss:$8 sps:$4 sm:$0xff]   ;;  %v754_v18 = vld [vmem:[#allocation7 + $0x4] ss:$8 sps:$4 sm:$0xff]   ;;  %v756_v19 = vld [vmem:[#allocation7] ss:$8 sps:$4 sm:$0xff]  }
  0x3b   :  { %374 = vmatpush1.bf16.msra.mxu1 %v738_v7  ;;  %v757_v20 = vld [vmem:[#allocation7 + $0xf4] ss:$8 sps:$4 sm:$0xff]   ;;  %v759_v21 = vld [vmem:[#allocation7 + $0xf0] ss:$8 sps:$4 sm:$0xff]   ;;  %v760_v22 = vld [vmem:[#allocation7 + $0xe4] ss:$8 sps:$4 sm:$0xff]  }
  0x3c   :  { %375 = vmatprep.subr.bf16.mxu1 %v739_v8  ;;  %v762_v23 = vld [vmem:[#allocation7 + $0xe0] ss:$8 sps:$4 sm:$0xff]   ;;  %v763_v24 = vld [vmem:[#allocation7 + $0xd4] ss:$8 sps:$4 sm:$0xff]   ;;  %v765_v25 = vld [vmem:[#allocation7 + $0xd0] ss:$8 sps:$4 sm:$0xff]  }
  0x3d   :  { %v766_v26 = vld [vmem:[#allocation7 + $0xc4] ss:$8 sps:$4 sm:$0xff]   ;;  %v768_v27 = vld [vmem:[#allocation7 + $0xc0] ss:$8 sps:$4 sm:$0xff]   ;;  %v769_v28 = vld [vmem:[#allocation7 + $0xb4] ss:$8 sps:$4 sm:$0xff]  }
  0x3e   :  { %v771_v29 = vld [vmem:[#allocation7 + $0xb0] ss:$8 sps:$4 sm:$0xff]   ;;  %v772_v30 = vld [vmem:[#allocation7 + $0xa4] ss:$8 sps:$4 sm:$0xff]   ;;  %v774_v31 = vld [vmem:[#allocation7 + $0xa0] ss:$8 sps:$4 sm:$0xff]  }
  0x3f   :  { %376 = vmatpush1.bf16.msra.mxu1 %v741_v9  ;;  %v775_v32 = vld [vmem:[#allocation7 + $0x94] ss:$8 sps:$4 sm:$0xff]   ;;  %v777_v33 = vld [vmem:[#allocation7 + $0x90] ss:$8 sps:$4 sm:$0xff]   ;;  %v778_v34 = vld [vmem:[#allocation7 + $0x84] ss:$8 sps:$4 sm:$0xff]  }
  0x40   :  { %377 = vmatprep.subr.bf16.mxu1 %v742_v10  ;;  %v780_v35 = vld [vmem:[#allocation7 + $0x80] ss:$8 sps:$4 sm:$0xff]   ;;  %v781_v36 = vld [vmem:[#allocation8 + $0x78] sm:$0xff]   ;;  %v783_v38 = vld [vmem:[#allocation8 + $0x70] sm:$0xff]   ;;  %v90_v47 = vshrl.u32 %v89_v46, 7 }
  0x41   :  { %v782_v37 = vld [vmem:[#allocation8 + $0x38] sm:$0xff]   ;;  %697 = vmatprep.subr.bf16.mxu0 %v781_v36  ;;  %v784_v39 = vld [vmem:[#allocation8 + $0x30] sm:$0xff]   ;;  %v786_v41 = vld [vmem:[#allocation8 + $0x28] sm:$0xff]  }
  0x42   :  { %698 = vmatpush3.bf16.msra.mxu0 %v782_v37  ;;  %v787_v42 = vld [vmem:[#allocation8 + $0x60] sm:$0xff]   ;;  %v789_v44 = vld [vmem:[#allocation8 + $0x58] sm:$0xff]   ;;  %v95_v48 = vsub.s32 1, %v90_v47  ;;  %v91_v49 = vsub.s32 0, %v90_v47  ;;  %v87_v50 = vld [vmem:[%s1004_s2] sm:$0x3] }
  0x43   :  { %378 = vmatpush1.bf16.msra.mxu1 %v744_v11  ;;  %699 = vmatprep.subr.bf16.mxu0 %v783_v38  ;;  %v788_v43 = vld [vmem:[#allocation8 + $0x20] sm:$0xff]   ;;  %v790_v45 = vld [vmem:[#allocation8 + $0x18] sm:$0xff]   ;;  %v791_v3 = vld [vmem:[#allocation8 + $0x50] sm:$0xff]  }
  0x44   :  { %379 = vmatprep.subr.bf16.mxu1 %v745_v12  ;;  %v96_v52 = vrot.slane %v87_v50, %v95_v48  ;;  %v92_v53 = vrot.slane %v87_v50, %v91_v49  ;;  %v792_v4 = vld [vmem:[#allocation8 + $0x10] sm:$0xff]   ;;  %v793_v5 = vld [vmem:[#allocation8 + $0x48] sm:$0xff]   ;;  %v795_v7 = vld [vmem:[#allocation8 + $0x40] sm:$0xff]  }
  0x45   :  { %v794_v6 = vld [vmem:[#allocation8 + $0x8] sm:$0xff]   ;;  %v796_v8 = vld [vmem:[#allocation8] sm:$0xff]  }
  0x46   :  { %700 = vmatpush3.bf16.msra.mxu0 %v784_v39  ;;  %v199_v9 = vld [vmem:[%s1006_s4] sm:$0x3] }
  0x47   :  { %380 = vmatpush1.bf16.msra.mxu1 %v747_v13  ;;  %701 = vmatprep.subr.bf16.mxu0 %v785_v40  ;;  %v208_v11 = vrot.slane %v199_v9, %v95_v48  ;;  %v204_v12 = vrot.slane %v199_v9, %v91_v49 }
  0x48   :  { %381 = vmatprep.subr.bf16.mxu1 %v748_v14 }
  0x4a   :  { %702 = vmatpush3.bf16.msra.mxu0 %v786_v41 }
  0x4b   :  { %382 = vmatpush1.bf16.msra.mxu1 %v750_v15  ;;  %703 = vmatprep.subr.bf16.mxu0 %v787_v42 }
  0x4c   :  { %383 = vmatprep.subr.bf16.mxu1 %v751_v16 }
  0x4e   :  { %704 = vmatpush3.bf16.msra.mxu0 %v788_v43 }
  0x4f   :  { %384 = vmatpush1.bf16.msra.mxu1 %v753_v17  ;;  %705 = vmatprep.subr.bf16.mxu0 %v789_v44 }
  0x50   :  { %385 = vmatprep.subr.bf16.mxu1 %v754_v18 }
  0x52   :  { %706 = vmatpush3.bf16.msra.mxu0 %v790_v45 }
  0x53   :  { %386 = vmatpush1.bf16.msra.mxu1 %v756_v19  ;;  %707 = vmatprep.subr.bf16.mxu0 %v791_v3 }
  0x54   :  { %387 = vmatprep.subr.bf16.mxu1 %v757_v20 }
  0x56   :  { %708 = vmatpush3.bf16.msra.mxu0 %v792_v4 }
  0x57   :  { %388 = vmatpush2.bf16.msra.mxu1 %v759_v21  ;;  %709 = vmatprep.subr.bf16.mxu0 %v793_v5 }
  0x58   :  { %389 = vmatprep.subr.bf16.mxu1 %v760_v22 }
  0x5a   :  { %710 = vmatpush3.bf16.msra.mxu0 %v794_v6 }
  0x5b   :  { %390 = vmatpush2.bf16.msra.mxu1 %v762_v23  ;;  %711 = vmatprep.subr.bf16.mxu0 %v795_v7 }
  0x5c   :  { %391 = vmatprep.subr.bf16.mxu1 %v763_v24 }
  0x5e   :  { %712 = vmatpush3.bf16.msra.mxu0 %v796_v8 }
  0x5f   :  { %392 = vmatpush2.bf16.msra.mxu1 %v765_v25 }
  0x60   :  { %393 = vmatprep.subr.bf16.mxu1 %v766_v26 }
  0x63   :  { %394 = vmatpush2.bf16.msra.mxu1 %v768_v27  ;;  %v597_v27 = vand.u32 127, %v89_v46 }
  0x64   :  { %395 = vmatprep.subr.bf16.mxu1 %v769_v28 }
  0x65   :  { %vm598_vm1 = vcmp.lt.s32.totalorder %v597_v27, 8 }
  0x67   :  { %396 = vmatpush2.bf16.msra.mxu1 %v771_v29  ;;  %v680_v29 = vld [vmem:[%s1008_s6] ss:$0 sm:$0xff]  ;;  %s922_s6 = smov [#allocation10]  }
  0x68   :  { %397 = vmatprep.subr.bf16.mxu1 %v772_v30  ;;  %s630_s25 = sshll.u32 %s922_s6, 4  ;;  %s631_s25 = int_to_ptr.vmem [resolvable:$true] %s630_s25 }
  0x69   :  { %s885_s26 = scalar_lea.vmem %s631_s25, 256  ;;  %p890_p7 = scmp.lt.s32.totalorder %s631_s25, %s631_s25 }
  0x6a   :  { %p886_p6 = scmp.ne.s32.totalorder %s631_s25, %s885_s26  ;;  %p891_p8 = scmp.lt.s32.totalorder %s885_s26, %s885_s26 }
  0x6b   :  { %398 = vmatpush2.bf16.msra.mxu1 %v774_v31 }
  0x6c   :  { %399 = vmatprep.subr.bf16.mxu1 %v775_v32  ;;  %p892_p9 = por %p891_p8, %p890_p7 }
  0x6e   :  { %p893_p10 = pnand %p892_p9, %p886_p6 }
  0x6f   :  { %400 = vmatpush2.bf16.msra.mxu1 %v777_v33 }
  0x70   :  { %401 = vmatprep.subr.bf16.mxu1 %v778_v34 }
  0x73   :  { %402 = vmatpush2.bf16.msra.mxu1 %v780_v35 }
  0xf9   :  { %v152_v51 = vpop.f32.mrf.mxu0 }
  0xfa   :  { %v153_v58 = vadd.f32 %v152_v51, %v92_v53 }
  0xfb   :  { %v154_v54 = vpop.f32.mrf.mxu0 }
  0xfc   :  { %v155_v56 = vadd.f32 %v154_v54, %v96_v52  ;;  %v161_v0 = vmax.f32 %v153_v58, 0.0 }
  0xfd   :  { %v156_v55 = vpop.f32.mrf.mxu0 }
  0xfe   :  { %v157_v57 = vadd.f32 %v156_v55, %v92_v53  ;;  %v162_v62 = vmax.f32 %v155_v56, 0.0 }
  0xff   :  { %v158_v59 = vpop.f32.mrf.mxu0 }
 0x100   :  { %v159_v60 = vadd.f32 %v158_v59, %v96_v52  ;;  %v163_v61 = vmax.f32 %v157_v57, 0.0 }
 0x102   :  { %v164_v63 = vmax.f32 %v159_v60, 0.0  ;;  %v165_v2 = vpack.c.bf16 %v163_v61, %v161_v0 }
 0x104   :  { %v166_v1 = vpack.c.bf16 %v164_v63, %v162_v62 }
 0x106   :  { %403 = vmatprep.mubr.bf16.mxu1 %v166_v1 }
 0x107   :  { %404 = vmatmul.mubr.bf16.vlgmr.msra.gmra.mxu1 %v165_v2 }
 0x1c7   :  { %v405_v10 = vpop.f32.mrf.mxu1 }
 0x1c8   :  { %v406_v17 = vadd.f32 %v405_v10, %v204_v12 }
 0x1c9   :  { %v407_v13 = vpop.f32.mrf.mxu1 }
 0x1ca   :  { %v408_v15 = vadd.f32 %v407_v13, %v208_v11  ;;  %v414_v23 = vmax.f32 %v406_v17, 0.0 }
 0x1cb   :  { %v409_v14 = vpop.f32.mrf.mxu1 }
 0x1cc   :  { %v410_v16 = vadd.f32 %v409_v14, %v204_v12  ;;  %v415_v21 = vmax.f32 %v408_v15, 0.0 }
 0x1cd   :  { %v411_v18 = vpop.f32.mrf.mxu1 }
 0x1ce   :  { %v412_v19 = vadd.f32 %v411_v18, %v208_v11  ;;  %v416_v20 = vmax.f32 %v410_v16, 0.0 }
 0x1d0   :  { %v417_v22 = vmax.f32 %v412_v19, 0.0  ;;  %v418_v25 = vpack.c.bf16 %v416_v20, %v414_v23 }
 0x1d2   :  { %v419_v24 = vpack.c.bf16 %v417_v22, %v415_v21 }
 0x1d4   :  { %587 = vmatprep.mubr.bf16.mxu0 %v419_v24 }
 0x1d5   :  { %588 = vmatmul.mubr.bf16.vlgmr.msra.gmra.mxu0 %v418_v25 }
 0x295   :  { %v713_v26 = vpop.f32.mrf.mxu0 }
 0x297   :  { %v714_v28 = vpop.f32.mrf.mxu0 }
 0x298   :  { %v715_v30 = vadd.f32 %v714_v28, %v713_v26 }
 0x299   :  { %v716_v31 = vpop.f32.mrf.mxu0 }
 0x29a   :  { %v590_v32 = vadd.f32 %v715_v30, %v680_v29 }
 0x29b   :  { %v717_v33 = vpop.f32.mrf.mxu0 }
 0x29c   :  { %v718_v34 = vadd.f32 %v717_v33, %v716_v31  ;;  %v599_v35 = vsel %vm598_vm1, %v590_v32, -1e+30 }
 0x29d   :  { %601 = vmax.xlane.f32.xlu0 %v599_v35 }
 0x29e   :  { %v593_v36 = vadd.f32 %v718_v34, %v680_v29 }
 0x2a0   :  { %v600_v37 = vsel %vm598_vm1, %v593_v36, -1e+30 }
 0x2a1   :  { %603 = vmax.xlane.f32.xlu0 %v600_v37 }
 0x326   :  { %v602_v38 = vpop.xlane.xlu0 %601 }
 0x327   :  { %v605_v39 = vsub.f32 %v599_v35, %v602_v38 }
 0x329   :  { %v607_v40 = vmul.f32 1.442695, %v605_v39 }
 0x32a   :  { %v604_v41 = vpop.xlane.xlu0 %603 }
 0x32b   :  { %797 = vpow2.f32 %v607_v40  ;;  %v606_v42 = vsub.f32 %v600_v37, %v604_v41 }
 0x32d   :  { %v609_v43 = vmul.f32 1.442695, %v606_v42 }
 0x32f   :  { %799 = vpow2.f32 %v609_v43 }
 0x338   :  { %v798_v44 = vpop.eup %797 }
 0x339   :  { %v611_v45 = vsel %vm598_vm1, %v798_v44, 0.0 }
 0x33a   :  { %613 = vadd.xlane.f32.xlu1 %v611_v45 }
 0x33c   :  { %v800_v46 = vpop.eup %799 }
 0x33d   :  { %v612_v47 = vsel %vm598_vm1, %v800_v46, 0.0 }
 0x33e   :  { %615 = vadd.xlane.f32.xlu1 %v612_v47 }
 0x3c3   :  { %v614_v48 = vpop.xlane.xlu1 %613 }
 0x3c4   :  { %801 = vrcp.f32 %v614_v48 }
 0x3c7   :  { %v616_v49 = vpop.xlane.xlu1 %615 }
 0x3c8   :  { %803 = vrcp.f32 %v616_v49 }
 0x3d1   :  { %v802_v50 = vpop.eup %801 }
 0x3d2   :  { %v618_v51 = vmul.f32 %v802_v50, %v611_v45 }
 0x3d4   :  { %v621_v52 = vsel %vm598_vm1, %v618_v51, %v590_v32 }
 0x3d5   :  { %v804_v53 = vpop.eup %803  ;;  %623 = vst [vmem:[#allocation10] sm:$0xff] %v621_v52 }
 0x3d6   :  { %v620_v54 = vmul.f32 %v804_v53, %v612_v47 }
 0x3d8   :  { %v622_v55 = vsel %vm598_vm1, %v620_v54, %v593_v36 }
 0x3d9   :  { %624 = vst [vmem:[#allocation10 + $0x8] sm:$0xff] %v622_v55 }
 0x3da   :  { %896 = shalt.err (!%p893_p10)
}
 0x3db   :  { %636 = dma.vmem_to_hbm [thread:$0]  %s631_s25, 256, %s1009_s7, [#allocation4], %s914_s27, %s914_s27, %s915_s28  }
 0x3dc   :  { %911 = dma.done.wait [#allocation4], 256  }
 0x3dd   :  { %912 = vsyncadd [#allocation4], 4294967040 }
 0x3de   :  { %640 = vsyncpa [#allocation3], 1 }
 0x3df   :  { %641 = vsyncpa [#allocation6], 1 }
 0x3e0   :  { %642 = vsyncpa [#allocation9], 1 }
 0x3e1   :  { %643 = vsyncpa [#allocation4], 1 }

</bundles_post_ra>
